<compile_context>
chip_gen: v7x
topology: tpu7x:2x2x1
jax: 0.10.0
libtpu: 0.0.40
codegen_flags: <defaults>
</compile_context>

<pallas_src>
import jax
import jax.numpy as jnp
import numpy as np
from jax.experimental import pallas as pl
from jax.experimental.pallas import tpu as pltpu


def ca_kernel(w1t_ref, w2_ref, x_ref, o_ref):
    # w1t_ref: (C, Cr) f32   -- conv1 weight (Cr, C, 1, 1) reshaped + transposed
    # w2_ref:  (C, Cr) f32   -- conv2 weight (C, Cr, 1, 1) reshaped
    # x_ref:   (1, C, HW) input tile in VMEM (lane-dense last dim)
    # o_ref:   (1, C, HW) output tile in VMEM
    hw = x_ref.shape[2]

    # --- Global average / max pool over the spatial (lane) axis -> (C, 1) ---
    xf = x_ref[0].astype(jnp.float32)                     # no-op cast for f32 input
    avg = jnp.mean(xf, axis=1, keepdims=True)             # (C, 1)
    mx = jnp.max(xf, axis=1, keepdims=True)               # (C, 1)

    # --- Shared MLP: h = relu(W1 @ v); logits = W2 @ h (tiny, VPU/XLU only) ---
    w1t = w1t_ref[...]                                    # (C, Cr)
    w2 = w2_ref[...]                                      # (C, Cr)

    # W1 @ v : (Cr,) as a (1, Cr) row via sublane reduction.
    h_avg = jnp.maximum(jnp.sum(w1t * avg, axis=0, keepdims=True), 0.0)   # (1, Cr)
    h_max = jnp.maximum(jnp.sum(w1t * mx, axis=0, keepdims=True), 0.0)    # (1, Cr)

    # W2 @ h : (C, 1) via lane reduction.
    logit_avg = jnp.sum(w2 * h_avg, axis=1, keepdims=True)                # (C, 1)
    logit_max = jnp.sum(w2 * h_max, axis=1, keepdims=True)                # (C, 1)

    attn = jax.nn.sigmoid(logit_avg + logit_max)                          # (C, 1) f32

    # --- Modulate: re-read x from VMEM; multiply in the input dtype ---
    o_ref[0] = x_ref[0] * attn.astype(o_ref.dtype)


def ca_module(x, w1, w2):
    """x: (N, C, H, W); w1: (C//r, C, 1, 1); w2: (C, C//r, 1, 1). Channel attention."""
    N, C, H, W = x.shape
    Cr = w1.shape[0]
    HW = H * W

    # Layout plumbing (outside the kernel): lane-dense spatial dim, MLP weights
    # pre-arranged so the kernel needs no transposes.
    x3 = x.reshape(N, C, HW)
    w1t = jnp.transpose(w1.reshape(Cr, C)).astype(jnp.float32)   # (C, Cr)
    w2m = w2.reshape(C, Cr).astype(jnp.float32)                  # (C, Cr)

    # Double-buffered in + out slabs plus weights, with headroom.
    block_bytes = C * HW * x.dtype.itemsize
    vmem_limit = int(max(32 * 1024 * 1024,
                         min(6 * block_bytes + (1 << 20), 96 * 1024 * 1024)))

    out = pl.pallas_call(
        ca_kernel,
        out_shape=jax.ShapeDtypeStruct((N, C, HW), x.dtype),
        grid_spec=pltpu.PrefetchScalarGridSpec(
            num_scalar_prefetch=0,
            grid=(N,),
            in_specs=[
                pl.BlockSpec((C, Cr), lambda b: (0, 0)),          # w1^T (resident)
                pl.BlockSpec((C, Cr), lambda b: (0, 0)),          # w2   (resident)
                pl.BlockSpec((1, C, HW), lambda b: (b, 0, 0)),    # x slab
            ],
            out_specs=pl.BlockSpec((1, C, HW), lambda b: (b, 0, 0)),
        ),
        compiler_params=pltpu.CompilerParams(
            dimension_semantics=("parallel",),   # shard batch across TCs on v7x
            vmem_limit_bytes=vmem_limit,
        ),
    )(w1t, w2m, x3)

    return out.reshape(N, C, H, W)


def ca_module_ref(x, w1, w2):
    """Pure-JAX reference matching the PyTorch forward."""
    Cr, C = w1.shape[0], w1.shape[1]
    avg = jnp.mean(x, axis=(2, 3))                     # (N, C)
    mx = jnp.max(x, axis=(2, 3))                       # (N, C)
    w1m = w1.reshape(Cr, C)                            # (Cr, C)
    w2m = w2.reshape(C, Cr)                            # (C, Cr)

    def mlp(v):                                        # v: (N, C)
        h = jnp.maximum(v @ w1m.T, 0.0)                # (N, Cr)
        return h @ w2m.T                               # (N, C)

    attn = jax.nn.sigmoid(mlp(avg) + mlp(mx))          # (N, C)
    return x * attn[:, :, None, None]


if __name__ == "__main__":
    key = jax.random.PRNGKey(0)
    kx, k1, k2 = jax.random.split(key, 3)

    N, C, H, W = 2, 4, 16, 16
    reduction = 2
    Cr = C // reduction

    x = jax.random.normal(kx, (N, C, H, W), dtype=jnp.float32)
    # Conv2d(C, C//r, 1, bias=False) and Conv2d(C//r, C, 1, bias=False) weights.
    w1 = jax.random.normal(k1, (Cr, C, 1, 1), dtype=jnp.float32) * 0.1
    w2 = jax.random.normal(k2, (C, Cr, 1, 1), dtype=jnp.float32) * 0.1

    out = jax.block_until_ready(ca_module(x, w1, w2))
    ref = jax.block_until_ready(ca_module_ref(x, w1, w2))
    np.testing.assert_allclose(np.asarray(out), np.asarray(ref), atol=1e-5, rtol=1e-5)

    print("KERNEL_OK")
</pallas_src>

<mosaic_0001>
module attributes {stable_mosaic.version = 11 : i64} {
  func.func @ca_kernel(%arg0: i32, %arg1: memref<4x2xf32, #tpu.memory_space<vmem>>, %arg2: memref<4x2xf32, #tpu.memory_space<vmem>>, %arg3: memref<1x4x256xf32, #tpu.memory_space<vmem>>, %arg4: memref<1x4x256xf32, #tpu.memory_space<vmem>>) attributes {dimension_semantics = [#tpu.dimension_semantics<parallel>], iteration_bounds = array<i64: 2>, scalar_prefetch = 0 : i64, scratch_operands = 0 : i64, tpu.core_type = #tpu.core_type<tc>, window_params = [{pipeline_mode = #tpu.pipeline_mode<synchronous>, transform_indices = @transform_0, window_bounds = array<i64: 4, 2>}, {pipeline_mode = #tpu.pipeline_mode<synchronous>, transform_indices = @transform_1, window_bounds = array<i64: 4, 2>}, {transform_indices = @transform_2, window_bounds = array<i64: 1, 4, 256>}, {transform_indices = @transform_3, window_bounds = array<i64: 1, 4, 256>}]} {
    %c0 = arith.constant 0 : index
    %c0_0 = arith.constant 0 : index
    %c0_1 = arith.constant 0 : index
    %0 = vector.load %arg3[%c0, %c0_0, %c0_1] : memref<1x4x256xf32, #tpu.memory_space<vmem>>, vector<1x4x256xf32>
    %1 = vector.shape_cast %0 : vector<1x4x256xf32> to vector<4x256xf32>
    %cst = arith.constant dense<0.000000e+00> : vector<4xf32>
    %2 = vector.multi_reduction <add>, %1, %cst [1] : vector<4x256xf32> to vector<4xf32>
    %3 = vector.shape_cast %2 : vector<4xf32> to vector<4x1xf32>
    %cst_2 = arith.constant 2.560000e+02 : f32
    %4 = vector.broadcast %cst_2 : f32 to vector<4x1xf32>
    %5 = arith.divf %3, %4 : vector<4x1xf32>
    %cst_3 = arith.constant dense<0xFF800000> : vector<4xf32>
    %6 = vector.multi_reduction <maximumf>, %1, %cst_3 [1] : vector<4x256xf32> to vector<4xf32>
    %7 = vector.shape_cast %6 : vector<4xf32> to vector<4x1xf32>
    %c0_4 = arith.constant 0 : index
    %c0_5 = arith.constant 0 : index
    %8 = vector.load %arg1[%c0_4, %c0_5] : memref<4x2xf32, #tpu.memory_space<vmem>>, vector<4x2xf32>
    %c0_6 = arith.constant 0 : index
    %c0_7 = arith.constant 0 : index
    %9 = vector.load %arg2[%c0_6, %c0_7] : memref<4x2xf32, #tpu.memory_space<vmem>>, vector<4x2xf32>
    %10 = vector.broadcast %5 : vector<4x1xf32> to vector<4x2xf32>
    %11 = arith.mulf %8, %10 : vector<4x2xf32>
    %cst_8 = arith.constant dense<0.000000e+00> : vector<2xf32>
    %12 = vector.multi_reduction <add>, %11, %cst_8 [0] : vector<4x2xf32> to vector<2xf32>
    %13 = vector.shape_cast %12 : vector<2xf32> to vector<1x2xf32>
    %cst_9 = arith.constant 0.000000e+00 : f32
    %14 = vector.broadcast %cst_9 : f32 to vector<1x2xf32>
    %15 = arith.maximumf %13, %14 : vector<1x2xf32>
    %16 = vector.broadcast %7 : vector<4x1xf32> to vector<4x2xf32>
    %17 = arith.mulf %8, %16 : vector<4x2xf32>
    %cst_10 = arith.constant dense<0.000000e+00> : vector<2xf32>
    %18 = vector.multi_reduction <add>, %17, %cst_10 [0] : vector<4x2xf32> to vector<2xf32>
    %19 = vector.shape_cast %18 : vector<2xf32> to vector<1x2xf32>
    %cst_11 = arith.constant 0.000000e+00 : f32
    %20 = vector.broadcast %cst_11 : f32 to vector<1x2xf32>
    %21 = arith.maximumf %19, %20 : vector<1x2xf32>
    %22 = vector.broadcast %15 : vector<1x2xf32> to vector<4x2xf32>
    %23 = arith.mulf %9, %22 : vector<4x2xf32>
    %cst_12 = arith.constant dense<0.000000e+00> : vector<4xf32>
    %24 = vector.multi_reduction <add>, %23, %cst_12 [1] : vector<4x2xf32> to vector<4xf32>
    %25 = vector.shape_cast %24 : vector<4xf32> to vector<4x1xf32>
    %26 = vector.broadcast %21 : vector<1x2xf32> to vector<4x2xf32>
    %27 = arith.mulf %9, %26 : vector<4x2xf32>
    %cst_13 = arith.constant dense<0.000000e+00> : vector<4xf32>
    %28 = vector.multi_reduction <add>, %27, %cst_13 [1] : vector<4x2xf32> to vector<4xf32>
    %29 = vector.shape_cast %28 : vector<4xf32> to vector<4x1xf32>
    %30 = arith.addf %25, %29 : vector<4x1xf32>
    %31 = arith.negf %30 : vector<4x1xf32>
    %32 = math.exp %31 : vector<4x1xf32>
    %cst_14 = arith.constant 1.000000e+00 : f32
    %33 = vector.broadcast %cst_14 : f32 to vector<4x1xf32>
    %34 = arith.addf %33, %32 : vector<4x1xf32>
    %35 = arith.divf %33, %34 : vector<4x1xf32>
    %c0_15 = arith.constant 0 : index
    %c0_16 = arith.constant 0 : index
    %c0_17 = arith.constant 0 : index
    %36 = vector.load %arg3[%c0_15, %c0_16, %c0_17] : memref<1x4x256xf32, #tpu.memory_space<vmem>>, vector<1x4x256xf32>
    %37 = vector.shape_cast %36 : vector<1x4x256xf32> to vector<4x256xf32>
    %38 = vector.broadcast %35 : vector<4x1xf32> to vector<4x256xf32>
    %39 = arith.mulf %37, %38 : vector<4x256xf32>
    %c0_18 = arith.constant 0 : index
    %c0_19 = arith.constant 0 : index
    %c0_20 = arith.constant 0 : index
    %40 = vector.load %arg4[%c0_18, %c0_19, %c0_20] : memref<1x4x256xf32, #tpu.memory_space<vmem>>, vector<1x4x256xf32>
    %41 = vector.shape_cast %40 : vector<1x4x256xf32> to vector<4x256xf32>
    %42 = vector.shape_cast %39 : vector<4x256xf32> to vector<1x4x256xf32>
    tpu.vector_store %arg4[%c0_18, %c0_19, %c0_20], %42 {strides = array<i32>} : memref<1x4x256xf32, #tpu.memory_space<vmem>>, vector<1x4x256xf32>,
    return
  }
  func.func @transform_0(%arg0: i32) -> (i32, i32) {
    %c0_i32 = arith.constant 0 : i32
    %c0_i32_0 = arith.constant 0 : i32
    %c0_i32_1 = arith.constant 0 : i32
    return %c0_i32, %c0_i32_0 : i32, i32
  }
  func.func @transform_1(%arg0: i32) -> (i32, i32) {
    %c0_i32 = arith.constant 0 : i32
    %c0_i32_0 = arith.constant 0 : i32
    %c0_i32_1 = arith.constant 0 : i32
    return %c0_i32, %c0_i32_0 : i32, i32
  }
  func.func @transform_2(%arg0: i32) -> (i32, i32, i32) {
    %c0_i32 = arith.constant 0 : i32
    %c0_i32_0 = arith.constant 0 : i32
    %c0_i32_1 = arith.constant 0 : i32
    return %arg0, %c0_i32, %c0_i32_0 : i32, i32, i32
  }
  func.func @transform_3(%arg0: i32) -> (i32, i32, i32) {
    %c0_i32 = arith.constant 0 : i32
    %c0_i32_0 = arith.constant 0 : i32
    %c0_i32_1 = arith.constant 0 : i32
    return %arg0, %c0_i32, %c0_i32_0 : i32, i32, i32
  }
}

</mosaic_0001>

<bundles_post_ra>
// kernel: tpu_custom_call.1
= control target key start
LH: loop header
LB: loop body
LE: loop exit
PB: predicated region body
PF: predicated region fallthrough
CT: control target
= control target key end

     0   :  { %8 = vsyncpa [#allocation3], 0  ;;  %s563_s0 = inlined_call_operand.vmem [shape: f32[4,2], index: 0, kind: input, shape index: {}]   ;;  %s564_s1 = inlined_call_operand.vmem [shape: f32[4,2], index: 1, kind: input, shape index: {}]   ;;  %s565_s2 = inlined_call_operand.vmem [shape: f32[2,4,256], index: 2, kind: input, shape index: {}]   ;;  %s566_s3 = inlined_call_operand.hbm [shape: f32[2,4,256], index: 3, kind: output, shape index: {}]  }
   0x1   :  { %10 = vsyncpa [#allocation3 + $0x1], 0  ;;  %s453_s12 = smov 0   ;;  %s455_s13 = smov 0  }
   0x2   :  { %s457_s14 = smov 0   ;;  %s459_s15 = smov 0  }
   0x3 LB: > { %s474_s16 = sadd.s32 4294967295, %s429_s15   ;;  %s307_s17 = sadd.s32 4294967294, %s429_s15   ;;  %s429_s15 = sphi %s459_s15, %s572_s15   ;;  %s425_s14 = sphi %s457_s14, %s571_s14   ;;  %s421_s13 = sphi %s455_s13, %s570_s13   ;;  %s417_s12 = sphi %s453_s12, %s569_s12  }
   0x4   : > { %s478_s18 = sadd.s32 1, %s429_s15   ;;  %s91_s19 = sadd.s32 1, %s425_s14 }
   0x5   : > { %s88_s20 = ssub.s32 %s429_s15, %s478_s18  ;;  %p101_p0 = scmp.ne.s32.totalorder %s425_s14, %s421_s13 }
   0x6   : > { %p89_p1 = scmp.eq.s32.totalorder %s88_s20, 0  ;;  %p102_p2 = scmp.eq.s32.totalorder %s474_s16, 1 }
   0x7   : > { %p107_p3 = scmp.ne.s32.totalorder %s421_s13, %s417_s12  ;;  %p108_p4 = scmp.eq.s32.totalorder %s307_s17, 1 }
   0x8   : > { %s489_s21 = scalar_select %p89_p1, %s425_s14, %s91_s19  }
   0x9   : > { %p491_p5 = por %p102_p2, %p101_p0  ;;  %p495_p6 = por %p108_p4, %p107_p3 }
   0xa   : > { %p310_p7 = scmp.ge.s32.totalorder %s429_s15, 1  ;;  %p140_p8 = scmp.lt.s32.totalorder %s429_s15, 3 }
   0xc   : > { %p141_p9 = pnand %p310_p7, %p140_p8 }
   0xd   : > { %p164_p10 = scmp.lt.s32.totalorder (!%p141_p9), %s474_s16, 1  ;;  %vm173_vm0 = vcmask (!%p141_p9), 1043456   ;;  %v186_v9 = vld [vmem:[%s563_s0] sm:$0xf] (!%p141_p9)  ;;  %vm189_vm1 = vcmask (!%p141_p9), 11264   ;;  %v226_v43 = vlaneseq (!%p141_p9)  ;;  %s161_s6 = sand.u32 (!%p141_p9), 1, %s421_s13  }
   0xe   : > { %144 = sbr.rel (%p141_p9) target bundleno = 387 (0x183), region = 32  ;;  %v187_v27 = vld [vmem:[%s564_s1] sm:$0xf] (!%p141_p9)  ;;  %v431_v41 = vmov (!%p141_p9), 839922192   ;;  %s311_s7 = sshll.u32 (!%p141_p9), %s161_s6, 3 }
   0xf   : > { %v224_v42 = vunpack.c.l.s4 (!%p141_p9), %v431_v41  ;;  %v227_v45 = vshrl.u32 (!%p141_p9), %v226_v43, 7  ;;  %s321_s8 = sshll.u32 (!%p141_p9), %s474_s16, 7  ;;  %s163_s9 = scalar_lea.vmem (!%p141_p9), [#allocation2], %s311_s7 }
  0x10   : > { %s248_s10 = sshll.u32 (!%p141_p9), %s163_s9, 4  ;;  %s521_s19 = scalar_lea.hbm (!%p141_p9), %s566_s3, %s321_s8  ;;  %s523_s10 = int_to_ptr.vmem [resolvable:$true] %s248_s10 }
  0x11   : > { %v225_v44 = vunpack.c.0.s8 (!%p141_p9), %v224_v42  ;;  %s234_s20 = scalar_lea.sflag (!%p141_p9), [#allocation3], %s161_s6 }
  0x13   : > { %v228_v46 = vsub.s32 (!%p141_p9), %v225_v44, %v227_v45 }
  0x15   : > { %s165_s24 = scalar_select %p164_p10, %s474_s16, 1 }
  0x16   : > { %s432_s16 = smov [#allocation2]  }
  0x17   : > { %s320_s25 = sshll.u32 %s165_s24, 3  ;;  %s367_s24 = scalar_lea.vmem %s523_s10, 128 }
  0x18   : > { %s168_s28 = scalar_lea.vmem %s565_s2, %s320_s25  ;;  %p368_p11 = scmp.ne.s32.totalorder %s523_s10, %s367_s24 }
  0x19   : > { %v169_v0 = vld [vmem:[%s168_s28] sm:$0xff]  ;;  %s371_s25 = sshll.u32 %s432_s16, 4  ;;  %s372_s25 = int_to_ptr.vmem [resolvable:$false] %s371_s25 }
  0x1a   : > { %v171_v1 = vcombine.high %v169_v0, %v169_v0  ;;  %v174_v2 = vsel %vm173_vm0, %v169_v0, 0.0  ;;  %v181_v4 = vsel %vm173_vm0, %v169_v0, -inf  ;;  %p369_p12 = pnand %p368_p11, %p491_p5  ;;  %s373_s26 = scalar_lea.vmem %s372_s25, 256 }
  0x1b   : > { %p374_p0 = scmp.lt.s32.totalorder %s523_s10, %s372_s25  ;;  %p375_p1 = scmp.lt.s32.totalorder %s373_s26, %s367_s24 }
  0x1c   : > { %v175_v3 = vsel %vm173_vm0, %v171_v1, 0.0  ;;  %v182_v5 = vsel %vm173_vm0, %v171_v1, -inf  ;;  %p370_p13 = pneg %p369_p12 }
  0x1d   : > { %v176_v6 = vadd.f32 %v175_v3, %v174_v2  ;;  %v183_v7 = vmax.f32 %v181_v4, %v182_v5  ;;  %p376_p2 = por %p375_p1, %p374_p0 }
  0x1f   : > { %177 = vadd.xlane.f32.xlu0 %v176_v6  ;;  %p377_p3 = pnand %p376_p2, %p370_p13 }
  0x23   : > { %184 = vmax.xlane.f32.xlu0 %v183_v7 }
  0xac   : > { %v178_v8 = vpop.xlane.xlu0 %177 }
  0xad   : > { %v180_v10 = vmul.f32 0.00390625, %v178_v8 }
  0xaf   : > { %v188_v11 = vmul.f32 %v186_v9, %v180_v10 }
  0xb0   : > { %v185_v12 = vpop.xlane.xlu0 %184 }
  0xb1   : > { %v190_v13 = vsel %vm189_vm1, %v188_v11, 0.0  ;;  %v198_v14 = vmul.f32 %v186_v9, %v185_v12 }
  0xb2   : > { %v191_v15 = vrot.slane %v190_v13, 4 }
  0xb3   : > { %v199_v16 = vsel %vm189_vm1, %v198_v14, 0.0 }
  0xb4   : > { %v192_v17 = vadd.f32 %v191_v15, %v190_v13  ;;  %v200_v18 = vrot.slane %v199_v16, 4 }
  0xb6   : > { %v193_v19 = vrot.slane %v192_v17, 2  ;;  %v201_v20 = vadd.f32 %v200_v18, %v199_v16 }
  0xb8   : > { %v202_v21 = vrot.slane %v201_v20, 2  ;;  %v194_v22 = vadd.f32 %v193_v19, %v192_v17 }
  0xba   : > { %v203_v23 = vadd.f32 %v202_v21, %v201_v20  ;;  %v195_v24 = vrot.slane %v194_v22, 1 }
  0xbc   : > { %v196_v25 = vadd.f32 %v195_v24, %v194_v22  ;;  %v204_v26 = vrot.slane %v203_v23, 1 }
  0xbe   : > { %v197_v28 = vmax.f32 %v196_v25, 0.0  ;;  %v205_v29 = vadd.f32 %v204_v26, %v203_v23 }
  0xc0   : > { %v207_v30 = vmul.f32 %v197_v28, %v187_v27  ;;  %v206_v31 = vmax.f32 %v205_v29, 0.0 }
  0xc2   : > { %v208_v32 = vsel %vm189_vm1, %v207_v30, 0.0  ;;  %v211_v33 = vmul.f32 %v206_v31, %v187_v27 }
  0xc3   : > { %209 = vadd.xlane.f32.xlu1 %v208_v32 }
  0xc4   : > { %v212_v34 = vsel %vm189_vm1, %v211_v33, 0.0 }
  0xc7   : > { %213 = vadd.xlane.f32.xlu1 %v212_v34 }
 0x150   : > { %v210_v35 = vpop.xlane.xlu1 %209 }
 0x154   : > { %v214_v36 = vpop.xlane.xlu1 %213 }
 0x155   : > { %v215_v37 = vadd.f32 %v214_v36, %v210_v35 }
 0x157   : > { %v314_v38 = vmul.f32 -1.442695, %v215_v37 }
 0x159   : > { %363 = vpow2.f32 %v314_v38 }
 0x163   : > { %v364_v39 = vpop.eup %363 }
 0x164   : > { %v219_v40 = vadd.f32 1.0, %v364_v39 }
 0x166   : > { %365 = vrcp.f32 %v219_v40 }
 0x170   : > { %v366_v47 = vpop.eup %365 }
 0x171   : > { %v229_v48 = vrot.slane %v366_v47, %v228_v46 }
 0x173   : > { %v231_v49 = vmul.f32 %v229_v48, %v169_v0 }
 0x175   : > { %232 = vst [vmem:[%s163_s9] sm:$0xff] %v231_v49 }
 0x176   : > { %380 = shalt.err (!%p377_p3)
}
 0x177   : > { %s381_s27 = scalar_lea.hbm %s521_s19, 128  ;;  %s385_s30 = scalar_lea.hbm %s566_s3, 256 }
 0x178   : > { %p382_p4 = scmp.ne.s32.totalorder %s521_s19, %s381_s27  ;;  %p386_p9 = scmp.lt.u32.totalorder %s521_s19, %s566_s3 }
 0x179   : > { %p387_p10 = scmp.lt.u32.totalorder %s385_s30, %s381_s27  ;;  %p389_p12 = scmp.lt.u32.totalorder %s381_s27, %s521_s19 }
 0x17a   : > { %p383_p7 = pnand %p382_p4, %p491_p5 }
 0x17b   : > { %p388_p11 = por %p387_p10, %p386_p9 }
 0x17c   : > { %p384_p8 = pneg %p383_p7 }
 0x17d   : > { %p390_p13 = por %p389_p12, %p388_p11 }
 0x17f   : > { %p391_p0 = pnand %p390_p13, %p384_p8 }
 0x181   : > { %394 = shalt.err (!%p391_p0)
}
 0x182   : > { %322 = dma.vmem_to_hbm [thread:$0]  (%p491_p5), %s523_s10, 128, %s521_s19, %s234_s20  }
 0x183 PF: > { %p328_p1 = scmp.ge.s32.totalorder %s429_s15, 2  ;;  %s260_s6 = sand.u32 1, %s417_s12  }
 0x184   : > { %s261_s7 = scalar_lea.sflag [#allocation3], %s260_s6 }
 0x185   : > { %p325_p2 = pnand %p328_p1, %p495_p6 }
 0x187   : > { %412 = dma.done.wait (!%p325_p2), %s261_s7, 128  }
 0x188   : > { %414 = vsyncadd (!%p325_p2), %s261_s7, 4294967168  ;;  %p13_p3 = scmp.ge.s32.totalorder %s478_s18, 4   ;;  %s569_s12 = smov %s421_s13 }
 0x189   : > { %s570_s13 = smov %s425_s14  ;;  %s571_s14 = smov %s489_s21 }
 0x18a   : > { %s572_s15 = smov %s478_s18  ;;  %15 = sbr.rel (!%p13_p3) target bundleno = 3 (0x3), region = 67 }
 0x191   :  { %266 = vsyncpa [#allocation3], 1 }
 0x192   :  { %268 = vsyncpa [#allocation3 + $0x1], 1 }

</bundles_post_ra>
